<compile_context>
chip_gen: v7x
topology: tpu7x:2x2x1
jax: 0.10.0
libtpu: 0.0.40
codegen_flags: <defaults>
</compile_context>

<pallas_src>
import math

import jax
import jax.numpy as jnp
from jax.experimental import pallas as pl
from jax.experimental.pallas import tpu as pltpu


def _round_up(x, m):
    return ((x + m - 1) // m) * m


def _conv_gemm_kernel(cols_ref, w_ref, b_ref, o_ref):
    # cols_ref: (1, TM, Kp)    im2col patch rows
    # w_ref:    (Kp, Coutp)    flattened HWIO filter, zero-padded, grid-invariant
    # b_ref:    (1, Coutp)     f32 bias row, grid-invariant
    # o_ref:    (1, TM, Coutp) lane-dense output tile
    acc = jnp.dot(cols_ref[0], w_ref[...], preferred_element_type=jnp.float32)
    o_ref[0] = (acc + b_ref[...]).astype(o_ref.dtype)


def _vmem_capacity_bytes():
    try:
        return int(pltpu.get_tpu_info().vmem_capacity_bytes)
    except Exception:
        return 64 * 1024 * 1024  # conservative (v7x-sized) fallback


def _choose_tm(M, tm_target):
    """Output-row tile: multiple of 8 (pref. 128, MXU-friendly), minimal Mp pad."""
    M8 = _round_up(M, 8)
    if M8 <= tm_target:
        return M8, M8
    best_tm, best_pad = None, None
    for tm in range(128, tm_target + 1, 128):
        pad = _round_up(M, tm) - M
        if best_pad is None or pad < best_pad or (pad == best_pad and tm > best_tm):
            best_tm, best_pad = tm, pad
    return best_tm, _round_up(M, best_tm)


def _single_buffered_spec(block_shape, index_map):
    """Grid-invariant block: request single buffering if the API allows it."""
    try:
        return pl.BlockSpec(block_shape, index_map, pipeline_mode=pl.Buffered(1))
    except Exception:
        return pl.BlockSpec(block_shape, index_map)


def conv2d_same(x_nchw, weight, bias, stride, *, compute_dtype="auto"):
    """TF-style SAME-padded conv2d as one lane-dense Pallas GEMM.

    x: (N, Cin, H, W), weight: (Cout, Cin, kH, kW), bias: (Cout,).
    compute_dtype: dtype of the GEMM operands. "auto" -> bfloat16 when the
    input is float32 (native MXU path, half the HBM bytes); None -> keep the
    input dtype.  Accumulation is f32 and the bias is added in f32 either way;
    the output keeps x's dtype.
    """
    N, Cin, H, W = x_nchw.shape
    Cout, _, kH, kW = weight.shape
    out_dtype = x_nchw.dtype

    if compute_dtype == "auto":
        compute_dtype = jnp.bfloat16 if x_nchw.dtype == jnp.float32 else None
    gemm_dtype = jnp.dtype(compute_dtype) if compute_dtype is not None else jnp.dtype(out_dtype)

    # ---- SAME padding arithmetic (TF convention) ----
    OH = math.ceil(H / stride)
    OW = math.ceil(W / stride)
    pad_h = max((OH - 1) * stride + kH - H, 0)
    pad_w = max((OW - 1) * stride + kW - W, 0)
    pad_top, pad_bot = pad_h // 2, pad_h - pad_h // 2
    pad_left, pad_right = pad_w // 2, pad_w - pad_w // 2

    # ---- wrapper-side layout glue: NHWC + pad + im2col (XLA ops) ----
    # TODO(synk): an in-kernel halo-block patch gather would avoid materializing
    # the kH*kW-replicated cols array in HBM (the remaining structural win).
    x_nhwc = jnp.transpose(x_nchw, (0, 2, 3, 1)).astype(gemm_dtype)
    x_pad = jnp.pad(
        x_nhwc, ((0, 0), (pad_top, pad_bot), (pad_left, pad_right), (0, 0))
    )

    K = kH * kW * Cin
    Kp = _round_up(K, 128)           # lane-dense contraction dim
    Coutp = _round_up(Cout, 128)     # lane-dense output dim (unmasked vst)
    M = OH * OW

    # ---- generation-aware tile sizing / VMEM budget ----
    in_itemsize = gemm_dtype.itemsize
    out_itemsize = jnp.dtype(out_dtype).itemsize
    if _vmem_capacity_bytes() >= 100 * 1024 * 1024:      # v5e / v6e: 128 MiB
        vmem_limit = 96 * 1024 * 1024
        gen_target = 1024 if Kp <= 256 else 512
    else:                                                # v7x: 64 MiB
        vmem_limit = 48 * 1024 * 1024
        gen_target = 256
    # Cap TM so double-buffered cols/out tiles + single-buffered weight/bias
    # stay comfortably within the limit.
    fixed_bytes = Kp * Coutp * in_itemsize + Coutp * 4
    per_row_bytes = 2 * Kp * in_itemsize + 2 * Coutp * out_itemsize
    avail = max(vmem_limit - fixed_bytes - (4 << 20), 128 * per_row_bytes)
    tm_cap = max(128, (avail // per_row_bytes) // 128 * 128)
    TM, Mp = _choose_tm(M, min(gen_target, tm_cap))

    taps = []
    for kh in range(kH):
        for kw in range(kW):
            taps.append(
                jax.lax.slice(
                    x_pad,
                    (0, kh, kw, 0),
                    (N,
                     kh + (OH - 1) * stride + 1,
                     kw + (OW - 1) * stride + 1,
                     Cin),
                    (1, stride, stride, 1),
                )  # (N, OH, OW, Cin)
            )
    if Kp > K:
        taps.append(jnp.zeros((N, OH, OW, Kp - K), x_pad.dtype))   # K padding
    cols = jnp.concatenate(taps, axis=-1).reshape(N, M, Kp)
    if Mp > M:
        cols = jnp.pad(cols, ((0, 0), (0, Mp - M), (0, 0)))

    # Weight: OIHW -> HWIO -> (K, Cout), GEMM dtype, zero-pad to (Kp, Coutp).
    w_mat = jnp.transpose(weight, (2, 3, 1, 0)).reshape(K, Cout).astype(gemm_dtype)
    w_mat = jnp.pad(w_mat, ((0, Kp - K), (0, Coutp - Cout)))

    # Bias: f32 (1, Coutp) row, added in the kernel epilogue (VPU slot is idle).
    b_row = jnp.pad(bias.astype(jnp.float32), (0, Coutp - Cout)).reshape(1, Coutp)

    # ---- grid: both axes parallel; larger trip count leads (v7x 2-TC balance)
    m_tiles = Mp // TM
    if m_tiles >= N:
        grid = (m_tiles, N)
        tile_map = lambda m, n: (n, m, 0)
    else:
        grid = (N, m_tiles)
        tile_map = lambda n, m: (n, m, 0)
    const2_map = lambda *_: (0, 0)

    cost = pl.CostEstimate(
        flops=2 * N * Mp * Kp * Coutp,
        transcendentals=0,
        bytes_accessed=(N * Mp * Kp + Kp * Coutp) * in_itemsize
        + Coutp * 4
        + N * Mp * Coutp * out_itemsize,
    )

    out_flat = pl.pallas_call(
        _conv_gemm_kernel,
        out_shape=jax.ShapeDtypeStruct((N, Mp, Coutp), out_dtype),
        grid_spec=pltpu.PrefetchScalarGridSpec(
            num_scalar_prefetch=0,
            grid=grid,
            in_specs=[
                pl.BlockSpec((1, TM, Kp), tile_map),
                # Grid-invariant blocks: single-buffered so pipelining VMEM
                # goes to the cols stream instead.
                _single_buffered_spec((Kp, Coutp), const2_map),
                _single_buffered_spec((1, Coutp), const2_map),
            ],
            out_specs=pl.BlockSpec((1, TM, Coutp), tile_map),
        ),
        compiler_params=pltpu.CompilerParams(
            dimension_semantics=("parallel", "parallel"),
            vmem_limit_bytes=vmem_limit,
        ),
        cost_estimate=cost,
    )(cols, w_mat, b_row)

    out = out_flat[:, :M, :Cout].reshape(N, OH, OW, Cout)
    # TODO(synk): keep NHWC end-to-end in a real network to drop this transpose.
    return jnp.transpose(out, (0, 3, 1, 2))  # back to NCHW


def make_params(key, num_output, in_channels, kernel_size):
    """Kaiming-normal (fan_in, a=0) weight init + zero bias, as in the module."""
    fan_in = in_channels * kernel_size * kernel_size
    std = math.sqrt(2.0 / fan_in)
    weight = std * jax.random.normal(
        key, (num_output, in_channels, kernel_size, kernel_size), jnp.float32
    )
    bias = jnp.zeros((num_output,), jnp.float32)
    return weight, bias


# TODO(synk): the reference forward() is `pass` (returns None); the conv above
# implements the semantics implied by the module name and constructor args.

if __name__ == "__main__":
    key = jax.random.PRNGKey(0)
    kx, kparam = jax.random.split(key)

    N, Cin, H, W = 2, 4, 16, 16
    num_output, kernel_size, stride = 8, 3, 2

    x = jax.random.normal(kx, (N, Cin, H, W), jnp.float32)
    weight, bias = make_params(kparam, num_output, Cin, kernel_size)

    OH = math.ceil(H / stride)
    OW = math.ceil(W / stride)

    # Default path: bf16 GEMM operands, f32 accumulation + f32 bias epilogue.
    y = conv2d_same(x, weight, bias, stride)
    jax.block_until_ready(y)
    assert y.shape == (N, num_output, OH, OW)
    assert y.dtype == x.dtype

    # Reference with identically bf16-rounded operands (both sides accumulate
    # in f32, so only summation-order noise remains).
    x_bf = x.astype(jnp.bfloat16).astype(jnp.float32)
    w_bf = weight.astype(jnp.bfloat16).astype(jnp.float32)
    ref_bf = jax.lax.conv_general_dilated(
        x_bf, w_bf, (stride, stride), "SAME",
        dimension_numbers=("NCHW", "OIHW", "NCHW"),
        precision=jax.lax.Precision.HIGHEST,
    ) + bias[None, :, None, None]
    err_bf = float(jnp.max(jnp.abs(y - ref_bf)))
    assert err_bf < 2e-3, f"bf16-path max abs error {err_bf}"

    # Explicit f32-operand path against the exact reference.
    y32 = conv2d_same(x, weight, bias, stride, compute_dtype=None)
    jax.block_until_ready(y32)
    ref = jax.lax.conv_general_dilated(
        x, weight, (stride, stride), "SAME",
        dimension_numbers=("NCHW", "OIHW", "NCHW"),
        precision=jax.lax.Precision.HIGHEST,
    ) + bias[None, :, None, None]
    err32 = float(jnp.max(jnp.abs(y32 - ref)))
    assert err32 < 1e-3, f"f32-path max abs error {err32}"

    print("KERNEL_OK")
</pallas_src>

<mosaic_0001>
module attributes {stable_mosaic.version = 11 : i64} {
  func.func @_conv_gemm_kernel(%arg0: i32, %arg1: i32, %arg2: memref<1x64x128xbf16, #tpu.memory_space<vmem>>, %arg3: memref<128x128xbf16, #tpu.memory_space<vmem>>, %arg4: memref<1x128xf32, #tpu.memory_space<vmem>>, %arg5: memref<1x64x128xf32, #tpu.memory_space<vmem>>) attributes {dimension_semantics = [#tpu.dimension_semantics<parallel>, #tpu.dimension_semantics<parallel>], iteration_bounds = array<i64: 2, 1>, scalar_prefetch = 0 : i64, scratch_operands = 0 : i64, tpu.core_type = #tpu.core_type<tc>, window_params = [{transform_indices = @transform_0, window_bounds = array<i64: 1, 64, 128>}, {pipeline_mode = #tpu.pipeline_mode<synchronous>, transform_indices = @transform_1, window_bounds = array<i64: 128, 128>}, {pipeline_mode = #tpu.pipeline_mode<synchronous>, transform_indices = @transform_2, window_bounds = array<i64: 1, 128>}, {transform_indices = @transform_3, window_bounds = array<i64: 1, 64, 128>}]} {
    %c0 = arith.constant 0 : index
    %c0_0 = arith.constant 0 : index
    %c0_1 = arith.constant 0 : index
    %0 = vector.load %arg2[%c0, %c0_0, %c0_1] : memref<1x64x128xbf16, #tpu.memory_space<vmem>>, vector<1x64x128xbf16>
    %1 = vector.shape_cast %0 : vector<1x64x128xbf16> to vector<64x128xbf16>
    %c0_2 = arith.constant 0 : index
    %c0_3 = arith.constant 0 : index
    %2 = vector.load %arg3[%c0_2, %c0_3] : memref<128x128xbf16, #tpu.memory_space<vmem>>, vector<128x128xbf16>
    %cst = arith.constant dense<0.000000e+00> : vector<64x128xf32>
    %3 = tpu.matmul %1, %2, %cst {dimension_numbers = #tpu.dot_dimension_numbers<[1], [0], [0], [1], [0, 0, 1, 1], [], []>} : vector<64x128xbf16>, vector<128x128xbf16>, vector<64x128xf32> -> vector<64x128xf32>
    %c0_4 = arith.constant 0 : index
    %c0_5 = arith.constant 0 : index
    %4 = vector.load %arg4[%c0_4, %c0_5] : memref<1x128xf32, #tpu.memory_space<vmem>>, vector<1x128xf32>
    %5 = vector.broadcast %4 : vector<1x128xf32> to vector<64x128xf32>
    %6 = arith.addf %3, %5 : vector<64x128xf32>
    %c0_6 = arith.constant 0 : index
    %c0_7 = arith.constant 0 : index
    %c0_8 = arith.constant 0 : index
    %7 = vector.load %arg5[%c0_6, %c0_7, %c0_8] : memref<1x64x128xf32, #tpu.memory_space<vmem>>, vector<1x64x128xf32>
    %8 = vector.shape_cast %7 : vector<1x64x128xf32> to vector<64x128xf32>
    %9 = vector.shape_cast %6 : vector<64x128xf32> to vector<1x64x128xf32>
    tpu.vector_store %arg5[%c0_6, %c0_7, %c0_8], %9 {strides = array<i32>} : memref<1x64x128xf32, #tpu.memory_space<vmem>>, vector<1x64x128xf32>,
    return
  }
  func.func @transform_0(%arg0: i32, %arg1: i32) -> (i32, i32, i32) {
    %c0_i32 = arith.constant 0 : i32
    %c0_i32_0 = arith.constant 0 : i32
    return %arg0, %arg1, %c0_i32 : i32, i32, i32
  }
  func.func @transform_1(%arg0: i32, %arg1: i32) -> (i32, i32) {
    %c0_i32 = arith.constant 0 : i32
    %c0_i32_0 = arith.constant 0 : i32
    %c0_i32_1 = arith.constant 0 : i32
    return %c0_i32, %c0_i32_0 : i32, i32
  }
  func.func @transform_2(%arg0: i32, %arg1: i32) -> (i32, i32) {
    %c0_i32 = arith.constant 0 : i32
    %c0_i32_0 = arith.constant 0 : i32
    %c0_i32_1 = arith.constant 0 : i32
    return %c0_i32, %c0_i32_0 : i32, i32
  }
  func.func @transform_3(%arg0: i32, %arg1: i32) -> (i32, i32, i32) {
    %c0_i32 = arith.constant 0 : i32
    %c0_i32_0 = arith.constant 0 : i32
    return %arg0, %arg1, %c0_i32 : i32, i32, i32
  }
}

</mosaic_0001>

<bundles_post_ra>
// kernel: tpu_custom_call.1
= control target key start
LH: loop header
LB: loop body
LE: loop exit
PB: predicated region body
PF: predicated region fallthrough
CT: control target
= control target key end

     0   :  { %8 = vsyncpa [#allocation3], 0  ;;  %s1095_s0 = inlined_call_operand.hbm [shape: bf16[2,64,128], index: 0, kind: input, shape index: {}]   ;;  %s1096_s1 = inlined_call_operand.hbm [shape: bf16[128,128], index: 1, kind: input, shape index: {}]   ;;  %s1097_s2 = inlined_call_operand.vmem [shape: f32[1,128], index: 2, kind: input, shape index: {}]   ;;  %s1098_s3 = inlined_call_operand.hbm [shape: f32[2,64,128], index: 3, kind: output, shape index: {}]  }
   0x1   :  { %10 = vsyncpa [#allocation3 + $0x1], 0 }
   0x2   :  { %11 = vsyncpa [#allocation6], 0 }
   0x3   :  { %12 = vsyncpa [#allocation4], 0 }
   0x4   :  { %14 = vsyncpa [#allocation4 + $0x1], 0  ;;  %s860_s12 = smov 0   ;;  %s862_s13 = smov 0  }
   0x5   :  { %s864_s14 = smov 0   ;;  %s866_s15 = smov 0  }
   0x6   :  { %s868_s16 = smov 0   ;;  %s870_s17 = smov 0  }
   0x7 LB: > { %s514_s18 = sadd.s32 4294967295, %s831_s17   ;;  %s515_s19 = sadd.s32 4294967294, %s831_s17   ;;  %s831_s17 = sphi %s870_s17, %s20_s17   ;;  %s827_s16 = sphi %s868_s16, %s1122_s16   ;;  %s823_s15 = sphi %s866_s15, %s1121_s15   ;;  %s819_s14 = sphi %s864_s14, %s1120_s14   ;;  %s815_s13 = sphi %s862_s13, %s1119_s13   ;;  %s811_s12 = sphi %s860_s12, %s1118_s12  }
   0x8   : > { %p54_p0 = scmp.ne.s32.totalorder %s815_s13, %s811_s12  ;;  %p894_p1 = scmp.eq.s32.totalorder %s514_s18, 0 }
   0x9   : > { %p898_p2 = scmp.eq.s32.totalorder %s514_s18, 1  ;;  %p128_p3 = scmp.eq.s32.totalorder %s515_s19, 1 }
   0xa   : > { %s1103_s20 = scalar_select %p894_p1, 1, 0 }
   0xb   : > { %s1104_s21 = scalar_select %p898_p2, 1, 0 }
   0xc   : > { %p904_p4 = por %p894_p1, %p54_p0  ;;  %p516_p5 = scmp.ge.s32.totalorder %s831_s17, 1 }
   0xd   : > { %p909_p6 = por %p128_p3, %p54_p0  ;;  %p135_p7 = scmp.lt.s32.totalorder %s831_s17, 3 }
   0xe   : > { %s1105_s22 = scalar_select %p904_p4, 1, 0 }
   0xf   : > { %s1106_s23 = scalar_select %p909_p6, 1, 0 }
  0x10   : > { %p914_p8 = pnand %p516_p5, %p135_p7  ;;  %s833_s25 = smov [#allocation5]  }
  0x11   : > { %s147_s26 = sshll.u32 %s833_s25, 4  ;;  %s32_s28 = sadd.s32 1, %s827_s16  ;;  %s148_s26 = int_to_ptr.vmem [resolvable:$true] %s147_s26 }
  0x12   : > { %s1107_s24 = scalar_select %p914_p8, 1, 0 }
  0x13   : > { %p606_p9 = pneg %p914_p8  ;;  %s687_s4 = scalar_lea.hbm %s1096_s1, 1024 }
  0x14   : > { %p688_p12 = scmp.ne.s32.totalorder %s1096_s1, %s687_s4  ;;  %p694_p5 = scmp.lt.u32.totalorder %s687_s4, %s1096_s1 }
  0x15   : > { %p923_p11 = pnand %p606_p9, %p894_p1 }
  0x17   : > { %p689_p13 = pneg %p923_p11 }
  0x19   : > { %p690_p0 = pnand %p689_p13, %p688_p12 }
  0x1b   : > { %p691_p3 = pneg %p690_p0 }
  0x1d   : > { %p696_p7 = pnand %p694_p5, %p691_p3 }
  0x1f   : > { %699 = shalt.err (!%p696_p7)
}
  0x20   : > { %s700_s9 = scalar_lea.vmem %s148_s26, 1024  ;;  %p708_p1 = scmp.lt.s32.totalorder %s148_s26, %s148_s26 }
  0x21   : > { %p701_p9 = scmp.ne.s32.totalorder %s148_s26, %s700_s9  ;;  %p709_p4 = scmp.lt.s32.totalorder %s700_s9, %s700_s9 }
  0x23   : > { %p703_p10 = pnand %p701_p9, %p689_p13  ;;  %p710_p8 = por %p709_p4, %p708_p1 }
  0x25   : > { %p704_p6 = pneg %p703_p10 }
  0x27   : > { %p711_p2 = pnand %p710_p8, %p704_p6 }
  0x29   : > { %714 = shalt.err (!%p711_p2)
}
  0x2a   : > { %s834_s10 = smov 64   ;;  %s835_s11 = smov 4  }
  0x2b   : > { %609 = dma.hbm_to_vmem [thread:$0]  (!%p923_p11), %s1096_s1, 1024, %s148_s26, [#allocation6], %s834_s10, %s834_s10, %s835_s11  }
  0x2c   : > { %p34_p1 = scmp.ge.s32.totalorder %s32_s28, 2  ;;  %s41_s25 = sadd.s32 1, %s819_s14 }
  0x2d   : > { %p48_p2 = scmp.ne.s32.totalorder %s819_s14, %s815_s13  ;;  %p49_p4 = scmp.eq.s32.totalorder %s831_s17, 0 }
  0x2e   : > { %s1124_s28 = smov (%p34_p1, %s32_s28), 0  ;;  %p1110_p8 = scmp.ne.s32.totalorder %s1104_s21, 0 }
  0x2f   : > { %p953_p6 = por %p49_p4, %p48_p2  ;;  %s36_s30 = ssub.s32 %s827_s16, %s1124_s28 }
  0x30   : > { %p959_p10 = por %p1110_p8, %p48_p2  ;;  %p619_p12 = scmp.lt.s32.totalorder %s831_s17, 2 }
  0x31   : > { %p39_p11 = scmp.eq.s32.totalorder %s36_s30, 0  ;;  %s164_s26 = sand.u32 1, %s819_s14  }
  0x32   : > { %s519_s4 = sshll.u32 %s164_s26, 5  ;;  %s544_s6 = sshll.u32 %s827_s16, 9 }
  0x33   : > { %s968_s5 = scalar_select %p39_p11, %s819_s14, %s41_s25  }
  0x34   : > { %s974_s9 = scalar_lea.hbm %s1095_s0, %s544_s6  ;;  %s168_s21 = scalar_lea.vmem [#allocation2], %s519_s4 }
  0x35   : > { %s177_s18 = sshll.u32 %s168_s21, 4  ;;  %p980_p13 = pnand %p619_p12, %p953_p6  ;;  %s976_s18 = int_to_ptr.vmem [resolvable:$true] %s177_s18 }
  0x36   : > { %s984_s25 = scalar_lea.sflag [#allocation3], %s164_s26  ;;  %s715_s30 = scalar_lea.hbm %s974_s9, 512 }
  0x37   : > { %p716_p0 = scmp.ne.s32.totalorder %s974_s9, %s715_s30  ;;  %p717_p3 = pneg %p980_p13 }
  0x38   : > { %s720_s29 = scalar_lea.hbm %s1095_s0, 1024  ;;  %p721_p9 = scmp.lt.u32.totalorder %s974_s9, %s1095_s0 }
  0x39   : > { %p718_p5 = pnand %p717_p3, %p716_p0  ;;  %p722_p1 = scmp.lt.u32.totalorder %s720_s29, %s715_s30 }
  0x3a   : > { %p724_p4 = scmp.lt.u32.totalorder %s715_s30, %s974_s9 }
  0x3b   : > { %p719_p7 = pneg %p718_p5  ;;  %p723_p2 = por %p722_p1, %p721_p9 }
  0x3d   : > { %p725_p6 = por %p724_p4, %p723_p2 }
  0x3f   : > { %p726_p8 = pnand %p725_p6, %p719_p7 }
  0x41   : > { %729 = shalt.err (!%p726_p8)
}
  0x42   : > { %s730_s26 = scalar_lea.vmem %s976_s18, 512  ;;  %s836_s21 = smov [#allocation2]  }
  0x43   : > { %p731_p12 = scmp.ne.s32.totalorder %s976_s18, %s730_s26  ;;  %s735_s4 = sshll.u32 %s836_s21, 4  ;;  %s736_s4 = int_to_ptr.vmem [resolvable:$false] %s735_s4 }
  0x44   : > { %s737_s6 = scalar_lea.vmem %s736_s4, 1024  ;;  %p738_p5 = scmp.lt.s32.totalorder %s976_s18, %s736_s4 }
  0x45   : > { %p733_p11 = pnand %p731_p12, %p717_p3  ;;  %p739_p9 = scmp.lt.s32.totalorder %s737_s6, %s730_s26 }
  0x47   : > { %p734_p0 = pneg %p733_p11  ;;  %p740_p1 = por %p739_p9, %p738_p5 }
  0x49   : > { %p741_p2 = pnand %p740_p1, %p734_p0 }
  0x4b   : > { %744 = shalt.err (!%p741_p2)
}
  0x4c   : > { %613 = dma.hbm_to_vmem [thread:$0]  (!%p980_p13), %s974_s9, 512, %s976_s18, %s984_s25, %s834_s10, %s834_s10, %s835_s11  }
  0x4d   : > { %p1113_p3 = scmp.ne.s32.totalorder %s1107_s24, 0 }
  0x4e   : > { %s1018_s30 = sand.u32 (!%p1113_p3), 1, %s815_s13   ;;  %p1114_p7 = scmp.ne.s32.totalorder (!%p1113_p3), %s1105_s22, 0 }
  0x4f   : > { %189 = sbr.rel (%p1113_p3) target bundleno = 355 (0x163), region = 32  ;;  %s523_s29 = sshll.u32 (!%p1113_p3), %s1018_s30, 5 }
  0x50   : > { %s192_s7 = scalar_lea.sflag (!%p1113_p3), [#allocation3], %s1018_s30  ;;  %s1022_s8 = scalar_lea.vmem (!%p1113_p3), [#allocation2], %s523_s29 }
  0x56   : > { %798 = dma.done.wait (%p1114_p7), %s192_s7, 512  }
  0x57   : > { %800 = vsyncadd (%p1114_p7), %s192_s7, 4294966784  ;;  %p1115_p13 = scmp.ne.s32.totalorder %s1103_s20, 0 }
  0x59   : > { %802 = dma.done.wait (%p1115_p13), [#allocation6], 1024  }
  0x5a   : > { %804 = vsyncadd (%p1115_p13), [#allocation6], 4294966272  ;;  %v675_v0 = vld [vmem:[#allocation5] sm:$0xff]   ;;  %v676_v1 = vld [vmem:[#allocation5 + $0x8] sm:$0xff]   ;;  %s525_s20 = sshll.u32 %s1018_s30, 6  ;;  %s545_s9 = sshll.u32 %s823_s15, 10 }
  0x5b   : > { %558 = vmatprep.subr.bf16.mxu0 %v675_v0  ;;  %582 = vmatprep.subr.bf16.mxu1 %v675_v0  ;;  %v677_v2 = vld [vmem:[#allocation5 + $0x10] sm:$0xff]   ;;  %v678_v3 = vld [vmem:[#allocation5 + $0x18] sm:$0xff]   ;;  %v683_v4 = vld [vmem:[%s1022_s8] sm:$0xff]   ;;  %s221_s10 = scalar_lea.vmem [#allocation7], %s525_s20  ;;  %s1046_s19 = scalar_lea.hbm %s1098_s3, %s545_s9 }
  0x5c   : > { %559 = vmatpush3.bf16.msra.mxu0 %v675_v0  ;;  %590 = vmatpush3.bf16.msra.mxu1 %v675_v0  ;;  %v684_v5 = vld [vmem:[%s1022_s8 + $0x10] sm:$0xff]   ;;  %v679_v6 = vld [vmem:[#allocation5 + $0x20] sm:$0xff]   ;;  %v680_v7 = vld [vmem:[#allocation5 + $0x28] sm:$0xff]   ;;  %s417_s11 = sshll.u32 %s221_s10, 4  ;;  %s402_s25 = scalar_lea.sflag [#allocation4], %s1018_s30  ;;  %s1041_s11 = int_to_ptr.vmem [resolvable:$true] %s417_s11 }
  0x5d   : > { %560 = vmatprep.subr.bf16.mxu0 %v676_v1  ;;  %583 = vmatprep.subr.bf16.mxu1 %v676_v1  ;;  %v681_v8 = vld [vmem:[#allocation5 + $0x30] sm:$0xff]   ;;  %v682_v9 = vld [vmem:[#allocation5 + $0x38] sm:$0xff]   ;;  %v685_v10 = vld [vmem:[%s1022_s8 + $0x8] sm:$0xff]   ;;  %s745_s26 = scalar_lea.vmem %s1041_s11, 1024  ;;  %s837_s21 = smov [#allocation7]  }
  0x5e   : > { %574 = vmatprep.mubr.bf16.mxu0 %v683_v4  ;;  %578 = vmatprep.mubr.bf16.mxu1 %v684_v5  ;;  %v686_v11 = vld [vmem:[%s1022_s8 + $0x18] sm:$0xff]   ;;  %v526_v12 = vld [vmem:[%s1097_s2] ss:$0 sm:$0xff]  ;;  %p746_p4 = scmp.ne.s32.totalorder %s1041_s11, %s745_s26  ;;  %s749_s4 = sshll.u32 %s837_s21, 4  ;;  %s750_s4 = int_to_ptr.vmem [resolvable:$false] %s749_s4 }
  0x5f   : > { %s751_s6 = scalar_lea.vmem %s750_s4, 2048  ;;  %p752_p12 = scmp.lt.s32.totalorder %s1041_s11, %s750_s4 }
  0x60   : > { %561 = vmatpush3.bf16.msra.mxu0 %v676_v1  ;;  %591 = vmatpush3.bf16.msra.mxu1 %v676_v1  ;;  %p747_p6 = pnand %p746_p4, %p959_p10  ;;  %p753_p11 = scmp.lt.s32.totalorder %s751_s6, %s745_s26 }
  0x61   : > { %562 = vmatprep.subr.bf16.mxu0 %v677_v2  ;;  %584 = vmatprep.subr.bf16.mxu1 %v677_v2 }
  0x62   : > { %p748_p8 = pneg %p747_p6  ;;  %p754_p0 = por %p753_p11, %p752_p12 }
  0x64   : > { %563 = vmatpush3.bf16.msra.mxu0 %v677_v2  ;;  %592 = vmatpush3.bf16.msra.mxu1 %v677_v2  ;;  %p755_p5 = pnand %p754_p0, %p748_p8 }
  0x65   : > { %564 = vmatprep.subr.bf16.mxu0 %v678_v3  ;;  %585 = vmatprep.subr.bf16.mxu1 %v678_v3 }
  0x68   : > { %565 = vmatpush3.bf16.msra.mxu0 %v678_v3  ;;  %593 = vmatpush3.bf16.msra.mxu1 %v678_v3 }
  0x69   : > { %566 = vmatprep.subr.bf16.mxu0 %v679_v6  ;;  %586 = vmatprep.subr.bf16.mxu1 %v679_v6 }
  0x6c   : > { %567 = vmatpush3.bf16.msra.mxu0 %v679_v6  ;;  %594 = vmatpush3.bf16.msra.mxu1 %v679_v6 }
  0x6d   : > { %568 = vmatprep.subr.bf16.mxu0 %v680_v7  ;;  %587 = vmatprep.subr.bf16.mxu1 %v680_v7 }
  0x70   : > { %569 = vmatpush3.bf16.msra.mxu0 %v680_v7  ;;  %595 = vmatpush3.bf16.msra.mxu1 %v680_v7 }
  0x71   : > { %570 = vmatprep.subr.bf16.mxu0 %v681_v8  ;;  %588 = vmatprep.subr.bf16.mxu1 %v681_v8 }
  0x74   : > { %571 = vmatpush3.bf16.msra.mxu0 %v681_v8  ;;  %596 = vmatpush3.bf16.msra.mxu1 %v681_v8 }
  0x75   : > { %572 = vmatprep.subr.bf16.mxu0 %v682_v9  ;;  %589 = vmatprep.subr.bf16.mxu1 %v682_v9 }
  0x78   : > { %573 = vmatpush3.bf16.msra.mxu0 %v682_v9  ;;  %597 = vmatpush3.bf16.msra.mxu1 %v682_v9 }
  0x7b   : > { %575 = vmatmul.mubr.bf16.vlgmr.msra.gmra.mrb[0].mxu0 %v685_v10  ;;  %579 = vmatmul.mubr.bf16.vlgmr.msra.gmra.mrb[0].mxu1 %v686_v11 }
 0x14e   : > { %v576_v13 = vpop.f32.mrb[0].mxu0  ;;  %v580_v14 = vpop.f32.mrb[0].mxu1 }
 0x14f   : > { %v371_v15 = vadd.f32 %v576_v13, %v526_v12  ;;  %v387_v16 = vadd.f32 %v580_v14, %v526_v12  ;;  %v362_v17 = vpop.f32.mrb[1].mxu0  ;;  %v378_v18 = vpop.f32.mrb[1].mxu1 }
 0x150   : > { %v363_v19 = vadd.f32 %v526_v12, %v362_v17  ;;  %v379_v20 = vadd.f32 %v526_v12, %v378_v18  ;;  %v577_v21 = vpop.f32.mrb[2].mxu0  ;;  %v581_v22 = vpop.f32.mrb[2].mxu1 }
 0x151   : > { %395 = vst [vmem:[%s221_s10 + $0x10] sm:$0xff] %v371_v15  ;;  %399 = vst [vmem:[%s221_s10 + $0x30] sm:$0xff] %v387_v16  ;;  %v374_v23 = vadd.f32 %v577_v21, %v526_v12  ;;  %v390_v24 = vadd.f32 %v581_v22, %v526_v12  ;;  %v365_v25 = vpop.f32.mrb[3].mxu0  ;;  %v381_v26 = vpop.f32.mrb[3].mxu1 }
 0x152   : > { %393 = vst [vmem:[%s221_s10] sm:$0xff] %v363_v19  ;;  %397 = vst [vmem:[%s221_s10 + $0x20] sm:$0xff] %v379_v20  ;;  %v366_v27 = vadd.f32 %v526_v12, %v365_v25  ;;  %v382_v28 = vadd.f32 %v526_v12, %v381_v26 }
 0x153   : > { %396 = vst [vmem:[%s221_s10 + $0x18] sm:$0xff] %v374_v23  ;;  %400 = vst [vmem:[%s221_s10 + $0x38] sm:$0xff] %v390_v24 }
 0x154   : > { %394 = vst [vmem:[%s221_s10 + $0x8] sm:$0xff] %v366_v27  ;;  %398 = vst [vmem:[%s221_s10 + $0x28] sm:$0xff] %v382_v28 }
 0x155   : > { %758 = shalt.err (!%p755_p5)
}
 0x156   : > { %s759_s29 = scalar_lea.hbm %s1046_s19, 1024  ;;  %s763_s20 = scalar_lea.hbm %s1098_s3, 2048 }
 0x157   : > { %p760_p9 = scmp.ne.s32.totalorder %s1046_s19, %s759_s29  ;;  %p764_p3 = scmp.lt.u32.totalorder %s1046_s19, %s1098_s3 }
 0x158   : > { %p765_p7 = scmp.lt.u32.totalorder %s763_s20, %s759_s29  ;;  %p767_p4 = scmp.lt.u32.totalorder %s759_s29, %s1046_s19 }
 0x159   : > { %p761_p1 = pnand %p760_p9, %p959_p10 }
 0x15a   : > { %p766_p13 = por %p765_p7, %p764_p3 }
 0x15b   : > { %p762_p2 = pneg %p761_p1 }
 0x15c   : > { %p768_p6 = por %p767_p4, %p766_p13 }
 0x15e   : > { %p769_p8 = pnand %p768_p6, %p762_p2 }
 0x160   : > { %772 = shalt.err (!%p769_p8)
}
 0x161   : > { %s838_s10 = smov 128   ;;  %s839_s9 = smov 8  }
 0x162   : > { %604 = dma.vmem_to_hbm [thread:$0]  (%p959_p10), %s1041_s11, 1024, %s1046_s19, %s402_s25, %s838_s10, %s838_s10, %s839_s9  }
 0x163 PF: > { %s432_s15 = sand.u32 1, %s811_s12   ;;  %p1116_p12 = scmp.ne.s32.totalorder %s1106_s23, 0 }
 0x164   : > { %p1117_p11 = scmp.ge.s32.totalorder %s831_s17, 2  ;;  %s433_s18 = scalar_lea.sflag [#allocation4], %s432_s15 }
 0x166   : > { %p615_p0 = pnand %p1117_p11, %p1116_p12 }
 0x168   : > { %806 = dma.done.wait (!%p615_p0), %s433_s18, 1024  }
 0x169   : > { %808 = vsyncadd (!%p615_p0), %s433_s18, 4294966272  ;;  %s20_s17 = sadd.s32 1, %s831_s17   ;;  %s1118_s12 = smov %s815_s13 }
 0x16a   : > { %p17_p5 = scmp.ge.s32.totalorder %s20_s17, 4   ;;  %s1119_s13 = smov %s819_s14 }
 0x16b   : > { %s1120_s14 = smov %s968_s5  ;;  %s1121_s15 = smov %s827_s16 }
 0x16c   : > { %s1122_s16 = smov %s1124_s28  ;;  %19 = sbr.rel (!%p17_p5) target bundleno = 7 (0x7), region = 81 }
 0x173   :  { %438 = vsyncpa [#allocation3], 1 }
 0x174   :  { %440 = vsyncpa [#allocation3 + $0x1], 1 }
 0x175   :  { %441 = vsyncpa [#allocation6], 1 }
 0x176   :  { %442 = vsyncpa [#allocation4], 1 }
 0x177   :  { %444 = vsyncpa [#allocation4 + $0x1], 1 }

</bundles_post_ra>
